<compile_context>
chip_gen: v5e
topology: v5e:2x2
jax: 0.10.0
libtpu: 0.0.40
codegen_flags: <defaults>
</compile_context>

<pallas_src>
import functools

import jax
import jax.numpy as jnp
from jax import lax
from jax.experimental import pallas as pl
from jax.experimental.pallas import tpu as pltpu


# --------------------------------------------------------------------------- #
# Kernels
# --------------------------------------------------------------------------- #
def _pipe_resident_kernel(x_ref, w_ref, b_ref, o_ref, *, num_partitions):
    """One row tile of the batch; all partition weights are VMEM-resident."""
    act0 = x_ref[...].astype(jnp.float32)           # bf16 tile -> f32 carry

    def stage(j, act):
        w = w_ref[j]                                 # (H, H) bf16
        b = b_ref[j]                                 # (1, H) f32
        # MXU: bf16 x bf16 -> f32 accumulate; bias + ReLU epilogue in f32.
        y = jnp.dot(act.astype(jnp.bfloat16), w,
                    preferred_element_type=jnp.float32) + b
        return jnp.maximum(y, 0.0)

    act = lax.fori_loop(0, num_partitions, stage, act0, unroll=True)
    o_ref[...] = act.astype(o_ref.dtype)


def _pipe_stream_kernel(x_ref, w_ref, b_ref, o_ref, act_ref, *, num_partitions):
    """Large-H path: partition index is an inner grid axis; one (H,H) weight
    block is live at a time and the activation is carried in VMEM scratch."""
    j = pl.program_id(1)

    @pl.when(j == 0)
    def _():
        act_ref[...] = x_ref[...].astype(jnp.float32)

    y = jnp.dot(act_ref[...].astype(jnp.bfloat16), w_ref[0],
                preferred_element_type=jnp.float32) + b_ref[0]
    act_ref[...] = jnp.maximum(y, 0.0)

    @pl.when(j == num_partitions - 1)
    def _():
        o_ref[...] = act_ref[...].astype(o_ref.dtype)


# --------------------------------------------------------------------------- #
# VMEM planning / tile selection
# --------------------------------------------------------------------------- #
def _vmem_plan(H, P, micro, out_itemsize, resident):
    in_bytes = 2 * micro * H * 2              # bf16 input tile, double-buffered
    out_bytes = 2 * micro * H * out_itemsize  # output tile, double-buffered
    act_bytes = micro * H * 4                 # carried f32 activation
    if resident:
        w_bytes = 2 * P * H * H * 2           # full bf16 weight stack (2 bufs)
        b_bytes = 2 * P * H * 4
    else:
        w_bytes = 2 * H * H * 2               # one stage's weights, 2 bufs
        b_bytes = 2 * H * 4
    return in_bytes + out_bytes + act_bytes + w_bytes + b_bytes


def _pick_row_tile(B, H, P, out_itemsize, budget, max_rows=512):
    # Largest divisor of B that is a multiple of 16 (bf16 sublane pack) and
    # whose *streaming-path* footprint (the floor any variant needs) fits VMEM.
    cands = [c for c in range(min(B, max_rows), 15, -1)
             if B % c == 0 and c % 16 == 0]
    assert cands, "batch rows must be a multiple of 16"
    micro = next((c for c in cands
                  if _vmem_plan(H, P, c, out_itemsize, resident=False) <= budget),
                 cands[-1])
    # v7x has 2 TensorCores: prefer an even number of parallel row tiles when
    # that does not shrink tiles below the MXU-filling 256 rows.
    if (B // micro) % 2 == 1 and micro % 32 == 0 and micro // 2 >= 256:
        micro //= 2
    return micro


# --------------------------------------------------------------------------- #
# Wrapper
# --------------------------------------------------------------------------- #
def pipe_forward(x, w_stack, b_stack, split_size=1, *, force_stream=False):
    """Forward pass of Pipe.  x: [B, H]; w_stack: [P, H, H]; b_stack: [P, 1, H].

    `split_size` only affects PyTorch-side scheduling (micro-batching is
    math-neutral), so the kernel picks its own row tile independently of it.
    """
    del split_size  # scheduling knob only; the computed values are identical.
    B, H = x.shape
    P = w_stack.shape[0]
    assert H % 128 == 0, "feature dim must be lane-dense (multiple of 128)"
    assert B % 16 == 0, "batch must be a multiple of 16 (bf16 sublane pack)"

    out_dtype = x.dtype
    out_itemsize = jnp.dtype(out_dtype).itemsize

    # bf16 activations/weights feed the MXU and halve activation HBM traffic;
    # bias, epilogue and the carried activation stay f32 (v5e VPU has no bf16).
    x_bf16 = x.astype(jnp.bfloat16)
    w_bf16 = w_stack.astype(jnp.bfloat16)
    b_f32 = b_stack.astype(jnp.float32)

    # Per-generation VMEM budget (~64 MiB/core on v7x, 128 MiB on v5e/v6e).
    try:
        vmem_cap = int(pltpu.get_tpu_info().vmem_capacity_bytes)
    except Exception:
        vmem_cap = 64 << 20  # conservative fallback (v7x per-core)
    budget = int(0.75 * vmem_cap)

    micro = _pick_row_tile(B, H, P, out_itemsize, budget)
    num_tiles = B // micro

    resident_bytes = _vmem_plan(H, P, micro, out_itemsize, resident=True)
    use_stream = force_stream or resident_bytes > budget
    vmem_needed = (_vmem_plan(H, P, micro, out_itemsize, resident=False)
                   if use_stream else resident_bytes)
    vmem_limit = int(min(max(vmem_needed + (2 << 20), 4 << 20), budget))

    cost = pl.CostEstimate(
        flops=2 * B * H * H * P + 2 * B * H * P,
        transcendentals=0,
        bytes_accessed=(x_bf16.size * 2 + w_bf16.size * 2 + b_f32.size * 4
                        + B * H * out_itemsize),
    )

    if not use_stream:
        # Fused-partition path: whole weight/bias stacks VMEM-resident
        # (constant index_map -> fetched from HBM exactly once).
        # NOTE: single-buffering these constant-index specs (pl.Buffered(1))
        # would halve their resident VMEM but is irrelevant at small H; the
        # streaming path below covers the large-H regime instead.
        kernel = functools.partial(_pipe_resident_kernel, num_partitions=P)
        return pl.pallas_call(
            kernel,
            out_shape=jax.ShapeDtypeStruct((B, H), out_dtype),
            grid=(num_tiles,),
            in_specs=[
                pl.BlockSpec((micro, H), lambda i: (i, 0)),
                pl.BlockSpec((P, H, H), lambda i: (0, 0, 0)),
                pl.BlockSpec((P, 1, H), lambda i: (0, 0, 0)),
            ],
            out_specs=pl.BlockSpec((micro, H), lambda i: (i, 0)),
            compiler_params=pltpu.CompilerParams(
                dimension_semantics=("parallel",),
                vmem_limit_bytes=vmem_limit,
            ),
            cost_estimate=cost,
        )(x_bf16, w_bf16, b_f32)

    # Streaming path (large P*H*H): partition index is an inner "arbitrary"
    # grid axis, only one (H,H) weight block is live (its DMA overlaps the
    # previous stage's matmul), activation carried in a VMEM scratch, output
    # tile written on the last partition.
    kernel = functools.partial(_pipe_stream_kernel, num_partitions=P)
    return pl.pallas_call(
        kernel,
        out_shape=jax.ShapeDtypeStruct((B, H), out_dtype),
        grid=(num_tiles, P),
        in_specs=[
            pl.BlockSpec((micro, H), lambda i, j: (i, 0)),
            pl.BlockSpec((1, H, H), lambda i, j: (j, 0, 0)),
            pl.BlockSpec((1, 1, H), lambda i, j: (j, 0, 0)),
        ],
        out_specs=pl.BlockSpec((micro, H), lambda i, j: (i, 0)),
        scratch_shapes=[pltpu.VMEM((micro, H), jnp.float32)],
        compiler_params=pltpu.CompilerParams(
            dimension_semantics=("parallel", "arbitrary"),
            vmem_limit_bytes=vmem_limit,
        ),
        cost_estimate=cost,
    )(x_bf16, w_bf16, b_f32)


def pipe_reference(x, w_stack, b_stack):
    """Plain-JAX reference mirroring the kernel's bf16-matmul / f32-epilogue."""
    act = x.astype(jnp.float32)
    w_bf16 = w_stack.astype(jnp.bfloat16)
    b_f32 = b_stack.astype(jnp.float32)
    for j in range(w_stack.shape[0]):
        y = jnp.dot(act.astype(jnp.bfloat16), w_bf16[j],
                    preferred_element_type=jnp.float32) + b_f32[j]
        act = jnp.maximum(y, 0.0)
    return act.astype(x.dtype)


if __name__ == "__main__":
    # Deterministic setup consistent with Pipe.__init__: P = 4 partitions
    # (Linear(H,H)+ReLU each), split_size = 2.  Small shapes: B=256, H=128.
    B, H, P = 256, 128, 4
    split_size = 2

    key = jax.random.PRNGKey(0)
    kx, kw, kb = jax.random.split(key, 3)

    x = jax.random.normal(kx, (B, H), dtype=jnp.float32)
    w_stack = jax.random.normal(kw, (P, H, H), dtype=jnp.float32) * 0.1
    b_stack = jax.random.normal(kb, (P, 1, H), dtype=jnp.float32) * 0.1

    ref = pipe_reference(x, w_stack, b_stack)

    # Default (resident-weight) path.
    out = jax.block_until_ready(pipe_forward(x, w_stack, b_stack, split_size))
    assert out.shape == (B, H) and out.dtype == x.dtype
    assert jnp.allclose(out, ref, atol=1e-2, rtol=1e-2), "resident path mismatch"

    # Also exercise the streamed-weight (large-H scaling) path on the same data.
    out_s = jax.block_until_ready(
        pipe_forward(x, w_stack, b_stack, split_size, force_stream=True))
    assert jnp.allclose(out_s, ref, atol=1e-2, rtol=1e-2), "stream path mismatch"

    print("KERNEL_OK")
</pallas_src>

<mosaic_0001>
module attributes {stable_mosaic.version = 11 : i64} {
  func.func @_pipe_resident_kernel(%arg0: i32, %arg1: memref<256x128xbf16, #tpu.memory_space<vmem>>, %arg2: memref<4x128x128xbf16, #tpu.memory_space<vmem>>, %arg3: memref<4x1x128xf32, #tpu.memory_space<vmem>>, %arg4: memref<256x128xf32, #tpu.memory_space<vmem>>) attributes {dimension_semantics = [#tpu.dimension_semantics<parallel>], iteration_bounds = array<i64: 1>, scalar_prefetch = 0 : i64, scratch_operands = 0 : i64, tpu.core_type = #tpu.core_type<tc>, window_params = [{transform_indices = @transform_0, window_bounds = array<i64: 256, 128>}, {pipeline_mode = #tpu.pipeline_mode<synchronous>, transform_indices = @transform_1, window_bounds = array<i64: 4, 128, 128>}, {pipeline_mode = #tpu.pipeline_mode<synchronous>, transform_indices = @transform_2, window_bounds = array<i64: 4, 1, 128>}, {transform_indices = @transform_3, window_bounds = array<i64: 256, 128>}]} {
    %c0 = arith.constant 0 : index
    %c0_0 = arith.constant 0 : index
    %0 = vector.load %arg1[%c0, %c0_0] : memref<256x128xbf16, #tpu.memory_space<vmem>>, vector<256x128xbf16>
    %1 = arith.extf %0 : vector<256x128xbf16> to vector<256x128xf32>
    %c0_i32 = arith.constant 0 : i32
    %2 = arith.index_cast %c0_i32 : i32 to index
    %c0_1 = arith.constant 0 : index
    %c0_2 = arith.constant 0 : index
    %3 = vector.load %arg2[%2, %c0_1, %c0_2] : memref<4x128x128xbf16, #tpu.memory_space<vmem>>, vector<1x128x128xbf16>
    %4 = vector.shape_cast %3 : vector<1x128x128xbf16> to vector<128x128xbf16>
    %5 = arith.index_cast %c0_i32 : i32 to index
    %c0_3 = arith.constant 0 : index
    %c0_4 = arith.constant 0 : index
    %6 = vector.load %arg3[%5, %c0_3, %c0_4] : memref<4x1x128xf32, #tpu.memory_space<vmem>>, vector<1x1x128xf32>
    %7 = vector.shape_cast %6 : vector<1x1x128xf32> to vector<1x128xf32>
    %8 = arith.truncf %1 : vector<256x128xf32> to vector<256x128xbf16>
    %cst = arith.constant dense<0.000000e+00> : vector<256x128xf32>
    %9 = tpu.matmul %8, %4, %cst {dimension_numbers = #tpu.dot_dimension_numbers<[1], [0], [0], [1], [0, 0, 1, 1], [], []>} : vector<256x128xbf16>, vector<128x128xbf16>, vector<256x128xf32> -> vector<256x128xf32>
    %10 = vector.broadcast %7 : vector<1x128xf32> to vector<256x128xf32>
    %11 = arith.addf %9, %10 : vector<256x128xf32>
    %cst_5 = arith.constant 0.000000e+00 : f32
    %12 = vector.broadcast %cst_5 : f32 to vector<256x128xf32>
    %13 = arith.maximumf %11, %12 : vector<256x128xf32>
    %c1_i32 = arith.constant 1 : i32
    %14 = arith.index_cast %c1_i32 : i32 to index
    %c0_6 = arith.constant 0 : index
    %c0_7 = arith.constant 0 : index
    %15 = vector.load %arg2[%14, %c0_6, %c0_7] : memref<4x128x128xbf16, #tpu.memory_space<vmem>>, vector<1x128x128xbf16>
    %16 = vector.shape_cast %15 : vector<1x128x128xbf16> to vector<128x128xbf16>
    %17 = arith.index_cast %c1_i32 : i32 to index
    %c0_8 = arith.constant 0 : index
    %c0_9 = arith.constant 0 : index
    %18 = vector.load %arg3[%17, %c0_8, %c0_9] : memref<4x1x128xf32, #tpu.memory_space<vmem>>, vector<1x1x128xf32>
    %19 = vector.shape_cast %18 : vector<1x1x128xf32> to vector<1x128xf32>
    %20 = arith.truncf %13 : vector<256x128xf32> to vector<256x128xbf16>
    %cst_10 = arith.constant dense<0.000000e+00> : vector<256x128xf32>
    %21 = tpu.matmul %20, %16, %cst_10 {dimension_numbers = #tpu.dot_dimension_numbers<[1], [0], [0], [1], [0, 0, 1, 1], [], []>} : vector<256x128xbf16>, vector<128x128xbf16>, vector<256x128xf32> -> vector<256x128xf32>
    %22 = vector.broadcast %19 : vector<1x128xf32> to vector<256x128xf32>
    %23 = arith.addf %21, %22 : vector<256x128xf32>
    %cst_11 = arith.constant 0.000000e+00 : f32
    %24 = vector.broadcast %cst_11 : f32 to vector<256x128xf32>
    %25 = arith.maximumf %23, %24 : vector<256x128xf32>
    %c2_i32 = arith.constant 2 : i32
    %26 = arith.index_cast %c2_i32 : i32 to index
    %c0_12 = arith.constant 0 : index
    %c0_13 = arith.constant 0 : index
    %27 = vector.load %arg2[%26, %c0_12, %c0_13] : memref<4x128x128xbf16, #tpu.memory_space<vmem>>, vector<1x128x128xbf16>
    %28 = vector.shape_cast %27 : vector<1x128x128xbf16> to vector<128x128xbf16>
    %29 = arith.index_cast %c2_i32 : i32 to index
    %c0_14 = arith.constant 0 : index
    %c0_15 = arith.constant 0 : index
    %30 = vector.load %arg3[%29, %c0_14, %c0_15] : memref<4x1x128xf32, #tpu.memory_space<vmem>>, vector<1x1x128xf32>
    %31 = vector.shape_cast %30 : vector<1x1x128xf32> to vector<1x128xf32>
    %32 = arith.truncf %25 : vector<256x128xf32> to vector<256x128xbf16>
    %cst_16 = arith.constant dense<0.000000e+00> : vector<256x128xf32>
    %33 = tpu.matmul %32, %28, %cst_16 {dimension_numbers = #tpu.dot_dimension_numbers<[1], [0], [0], [1], [0, 0, 1, 1], [], []>} : vector<256x128xbf16>, vector<128x128xbf16>, vector<256x128xf32> -> vector<256x128xf32>
    %34 = vector.broadcast %31 : vector<1x128xf32> to vector<256x128xf32>
    %35 = arith.addf %33, %34 : vector<256x128xf32>
    %cst_17 = arith.constant 0.000000e+00 : f32
    %36 = vector.broadcast %cst_17 : f32 to vector<256x128xf32>
    %37 = arith.maximumf %35, %36 : vector<256x128xf32>
    %c3_i32 = arith.constant 3 : i32
    %38 = arith.index_cast %c3_i32 : i32 to index
    %c0_18 = arith.constant 0 : index
    %c0_19 = arith.constant 0 : index
    %39 = vector.load %arg2[%38, %c0_18, %c0_19] : memref<4x128x128xbf16, #tpu.memory_space<vmem>>, vector<1x128x128xbf16>
    %40 = vector.shape_cast %39 : vector<1x128x128xbf16> to vector<128x128xbf16>
    %41 = arith.index_cast %c3_i32 : i32 to index
    %c0_20 = arith.constant 0 : index
    %c0_21 = arith.constant 0 : index
    %42 = vector.load %arg3[%41, %c0_20, %c0_21] : memref<4x1x128xf32, #tpu.memory_space<vmem>>, vector<1x1x128xf32>
    %43 = vector.shape_cast %42 : vector<1x1x128xf32> to vector<1x128xf32>
    %44 = arith.truncf %37 : vector<256x128xf32> to vector<256x128xbf16>
    %cst_22 = arith.constant dense<0.000000e+00> : vector<256x128xf32>
    %45 = tpu.matmul %44, %40, %cst_22 {dimension_numbers = #tpu.dot_dimension_numbers<[1], [0], [0], [1], [0, 0, 1, 1], [], []>} : vector<256x128xbf16>, vector<128x128xbf16>, vector<256x128xf32> -> vector<256x128xf32>
    %46 = vector.broadcast %43 : vector<1x128xf32> to vector<256x128xf32>
    %47 = arith.addf %45, %46 : vector<256x128xf32>
    %cst_23 = arith.constant 0.000000e+00 : f32
    %48 = vector.broadcast %cst_23 : f32 to vector<256x128xf32>
    %49 = arith.maximumf %47, %48 : vector<256x128xf32>
    %c4_i32 = arith.constant 4 : i32
    %c0_24 = arith.constant 0 : index
    %c0_25 = arith.constant 0 : index
    %50 = vector.load %arg4[%c0_24, %c0_25] : memref<256x128xf32, #tpu.memory_space<vmem>>, vector<256x128xf32>
    tpu.vector_store %arg4[%c0_24, %c0_25], %49 {strides = array<i32>} : memref<256x128xf32, #tpu.memory_space<vmem>>, vector<256x128xf32>,
    return
  }
  func.func @transform_0(%arg0: i32) -> (i32, i32) {
    %c0_i32 = arith.constant 0 : i32
    %c0_i32_0 = arith.constant 0 : i32
    return %arg0, %c0_i32 : i32, i32
  }
  func.func @transform_1(%arg0: i32) -> (i32, i32, i32) {
    %c0_i32 = arith.constant 0 : i32
    %c0_i32_0 = arith.constant 0 : i32
    %c0_i32_1 = arith.constant 0 : i32
    %c0_i32_2 = arith.constant 0 : i32
    return %c0_i32, %c0_i32_0, %c0_i32_1 : i32, i32, i32
  }
  func.func @transform_2(%arg0: i32) -> (i32, i32, i32) {
    %c0_i32 = arith.constant 0 : i32
    %c0_i32_0 = arith.constant 0 : i32
    %c0_i32_1 = arith.constant 0 : i32
    %c0_i32_2 = arith.constant 0 : i32
    return %c0_i32, %c0_i32_0, %c0_i32_1 : i32, i32, i32
  }
  func.func @transform_3(%arg0: i32) -> (i32, i32) {
    %c0_i32 = arith.constant 0 : i32
    %c0_i32_0 = arith.constant 0 : i32
    return %arg0, %c0_i32 : i32, i32
  }
}

</mosaic_0001>

<bundles_post_ra>
// kernel: tpu_custom_call.1
= control target key start
LH: loop header
LB: loop body
LE: loop exit
PB: predicated region body
PF: predicated region fallthrough
CT: control target
= control target key end

     0   :  { %8 = vsyncpa [#allocation3], 0  ;;  %s1586_s0 = inlined_call_operand.hbm [shape: bf16[256,128], index: 0, kind: input, shape index: {}]   ;;  %s1587_s1 = inlined_call_operand.hbm [shape: bf16[4,128,128], index: 1, kind: input, shape index: {}]   ;;  %s1588_s2 = inlined_call_operand.hbm [shape: f32[4,1,128], index: 2, kind: input, shape index: {}]   ;;  %s1589_s3 = inlined_call_operand.hbm [shape: f32[256,128], index: 3, kind: output, shape index: {}]  }
   0x1   :  { %9 = vsyncpa [#allocation6], 0 }
   0x2   :  { %10 = vsyncpa [#allocation4], 0  ;;  %s28_s14 = sshll.u32 %s1587_s1, 4  ;;  %s1408_s15 = smov [#allocation5]   ;;  %s29_s14 = int_to_ptr.hbm [resolvable:$true] %s28_s14 }
   0x3   :  { %s30_s16 = sshll.u32 %s1408_s15, 4  ;;  %s15_s19 = sshll.u32 %s1586_s0, 4  ;;  %s31_s16 = int_to_ptr.vmem [resolvable:$true] %s30_s16  ;;  %s16_s19 = int_to_ptr.hbm [resolvable:$true] %s15_s19 }
   0x4   :  { %s1409_s20 = smov 64   ;;  %s1410_s21 = smov 4  }
   0x5   :  { %36 = dma.hbm_to_vmem [thread:$0]  %s29_s14, 4096, %s31_s16, [#allocation6], %s1409_s20, %s1409_s20, %s1410_s21  }
   0x6   :  { %s1411_s22 = smov [#allocation2]   ;;  %s41_s26 = sshll.u32 %s1588_s2, 4  ;;  %s42_s26 = int_to_ptr.hbm [resolvable:$true] %s41_s26 }
   0x7   :  { %s17_s23 = sshll.u32 %s1411_s22, 4  ;;  %s1412_s1 = smov [#allocation7]   ;;  %s18_s23 = int_to_ptr.vmem [resolvable:$true] %s17_s23 }
   0x8   :  { %23 = dma.hbm_to_vmem [thread:$0]  %s16_s19, 2048, %s18_s23, [#allocation3], %s1409_s20, %s1409_s20, %s1410_s21  }
   0x9   :  { %s43_s27 = sshll.u32 %s1412_s1, 4  ;;  %s1413_s28 = smov 16   ;;  %s44_s27 = int_to_ptr.vmem [resolvable:$true] %s43_s27 }
   0xa   :  { %s1414_s29 = smov 1  }
   0xb   :  { %49 = dma.hbm_to_vmem [thread:$0]  %s42_s26, 64, %s44_s27, [#allocation6], %s1413_s28, %s1413_s28, %s1414_s29  }
   0xc   :  { %1402 = dma.done.wait [#allocation3], 2048  }
   0xd   :  { %1403 = vsyncadd [#allocation3], 4294965248 }
   0xe   :  { %1404 = dma.done.wait [#allocation6], 4160  }
   0xf   :  { %1405 = vsyncadd [#allocation6], 4294963136  ;;  %v1267_v0 = vld [vmem:[#allocation5 + $0x38] sm:$0xff]  ;;  %v1266_v1 = vld [vmem:[#allocation5 + $0x30] sm:$0xff]  ;;  %s1415_s0 = smov [#allocation8]   ;;  %s1038_s5 = sshll.u32 %s1589_s3, 4  ;;  %s1039_s5 = int_to_ptr.hbm [resolvable:$true] %s1038_s5 }
  0x10   :  { %258 = vmatpush.bf16.msra.mxu0 %v1267_v0  ;;  %v1265_v2 = vld [vmem:[#allocation5 + $0x28] sm:$0xff]  ;;  %v1264_v3 = vld [vmem:[#allocation5 + $0x20] sm:$0xff]  ;;  %v1263_v4 = vld [vmem:[#allocation5 + $0x18] sm:$0xff]  ;;  %s1036_s2 = sshll.u32 %s1415_s0, 4  ;;  %s1416_s6 = smov 128   ;;  %s1037_s2 = int_to_ptr.vmem [resolvable:$true] %s1036_s2 }
  0x11   :  { %v1262_v5 = vld [vmem:[#allocation5 + $0x10] sm:$0xff]  ;;  %v1261_v6 = vld [vmem:[#allocation5 + $0x8] sm:$0xff]  ;;  %v1260_v7 = vld [vmem:[#allocation5] sm:$0xff]  ;;  %s1417_s7 = smov 8  }
  0x12   :  { %v1244_v8 = vld [vmem:[#allocation2] sm:$0xff]  ;;  %v1245_v9 = vld [vmem:[#allocation2 + $0x8] sm:$0xff]  ;;  %v1246_v10 = vld [vmem:[#allocation2 + $0x10] sm:$0xff] }
  0x13   :  { %v1247_v11 = vld [vmem:[#allocation2 + $0x18] sm:$0xff]  ;;  %v1248_v12 = vld [vmem:[#allocation2 + $0x20] sm:$0xff]  ;;  %v1249_v14 = vld [vmem:[#allocation2 + $0x28] sm:$0xff] }
  0x14   :  { %259 = vmatpush.bf16.msra.mxu0 %v1266_v1  ;;  %v1275_v13 = vld [vmem:[#allocation5 + $0x78] sm:$0xff]  ;;  %v1274_v15 = vld [vmem:[#allocation5 + $0x70] sm:$0xff]  ;;  %v1273_v16 = vld [vmem:[#allocation5 + $0x68] sm:$0xff] }
  0x15   :  { %465 = vmatpush.bf16.msra.mxu1 %v1275_v13  ;;  %v1272_v17 = vld [vmem:[#allocation5 + $0x60] sm:$0xff]  ;;  %v1271_v18 = vld [vmem:[#allocation5 + $0x58] sm:$0xff]  ;;  %v1250_v19 = vld [vmem:[#allocation2 + $0x30] sm:$0xff] }
  0x16   :  { %v1270_v20 = vld [vmem:[#allocation5 + $0x50] sm:$0xff]  ;;  %v1269_v21 = vld [vmem:[#allocation5 + $0x48] sm:$0xff]  ;;  %v1268_v22 = vld [vmem:[#allocation5 + $0x40] sm:$0xff] }
  0x17   :  { %v1251_v23 = vld [vmem:[#allocation2 + $0x38] sm:$0xff]  ;;  %v1252_v24 = vld [vmem:[#allocation2 + $0x40] sm:$0xff]  ;;  %v1253_v33 = vld [vmem:[#allocation2 + $0x48] sm:$0xff] }
  0x18   :  { %260 = vmatpush.bf16.msra.mxu0 %v1265_v2  ;;  %v1447_v26 = vld [vmem:[#allocation7] ss:$0 sm:$0xff]  ;;  %v1254_v41 = vld [vmem:[#allocation2 + $0x50] sm:$0xff]  ;;  %v1255_v49 = vld [vmem:[#allocation2 + $0x58] sm:$0xff] }
  0x19   :  { %466 = vmatpush.bf16.msra.mxu1 %v1274_v15  ;;  %v1256_v57 = vld [vmem:[#allocation2 + $0x60] sm:$0xff]  ;;  %v1257_v1 = vld [vmem:[#allocation2 + $0x68] sm:$0xff] }
  0x1a   :  { %v1281_v13 = vld [vmem:[#allocation5 + $0xa8] sm:$0xff] }
  0x1c   :  { %261 = vmatpush.bf16.msra.mxu0 %v1264_v3 }
  0x1d   :  { %467 = vmatpush.bf16.msra.mxu1 %v1273_v16 }
  0x20   :  { %262 = vmatpush.bf16.msra.mxu0 %v1263_v4 }
  0x21   :  { %468 = vmatpush.bf16.msra.mxu1 %v1272_v17 }
  0x24   :  { %263 = vmatpush.bf16.msra.mxu0 %v1262_v5 }
  0x25   :  { %469 = vmatpush.bf16.msra.mxu1 %v1271_v18  ;;  %v1279_v18 = vld [vmem:[#allocation5 + $0x98] sm:$0xff] }
  0x28   :  { %264 = vmatpush.bf16.msra.mxu0 %v1261_v6  ;;  %v1283_v6 = vld [vmem:[#allocation5 + $0xb8] sm:$0xff] }
  0x29   :  { %470 = vmatpush.bf16.msra.mxu1 %v1270_v20  ;;  %672 = vmatpush.bf16.msra.mxu2 %v1283_v6 }
  0x2c   :  { %265 = vmatpush.bf16.msra.mxu0 %v1260_v7 }
  0x2d   :  { %471 = vmatpush.bf16.msra.mxu1 %v1269_v21 }
  0x2f   :  { %266 = vmatmul.bf16.vlgmr.msra.gmra.mxu0 %v1244_v8 }
  0x31   :  { %472 = vmatpush.bf16.msra.mxu1 %v1268_v22  ;;  %v1278_v22 = vld [vmem:[#allocation5 + $0x90] sm:$0xff] }
  0x3f   :  { %271 = vmatmul.bf16.gmra.mxu0 %v1245_v9 }
  0x4f   :  { %276 = vmatmul.bf16.gmra.mxu0 %v1246_v10  ;;  %v1282_v10 = vld [vmem:[#allocation5 + $0xb0] sm:$0xff] }
  0x50   :  { %673 = vmatpush.bf16.msra.mxu2 %v1282_v10 }
  0x54   :  { %674 = vmatpush.bf16.msra.mxu2 %v1281_v13 }
  0x5f   :  { %281 = vmatmul.bf16.gmra.mxu0 %v1247_v11  ;;  %v1258_v11 = vld [vmem:[#allocation2 + $0x70] sm:$0xff] }
  0x6f   :  { %286 = vmatmul.bf16.gmra.mxu0 %v1248_v12 }
  0x7f   :  { %291 = vmatmul.bf16.gmra.mxu0 %v1249_v14  ;;  %v1280_v14 = vld [vmem:[#allocation5 + $0xa0] sm:$0xff] }
  0x80   :  { %675 = vmatpush.bf16.msra.mxu2 %v1280_v14 }
  0x84   :  { %676 = vmatpush.bf16.msra.mxu2 %v1279_v18 }
  0x88   :  { %677 = vmatpush.bf16.msra.mxu2 %v1278_v22 }
  0x8f   :  { %296 = vmatmul.bf16.gmra.mxu0 %v1250_v19 }
  0x9f   :  { %301 = vmatmul.bf16.gmra.mxu0 %v1251_v23  ;;  %v1259_v23 = vld [vmem:[#allocation2 + $0x78] sm:$0xff] }
  0xac   :  { %v267_v25 = vpop.f32.mrf.mxu0 }
  0xad   :  { %v268_v27 = vadd.f32 %v1447_v26, %v267_v25  ;;  %v1277_v25 = vld [vmem:[#allocation5 + $0x88] sm:$0xff] }
  0xae   :  { %678 = vmatpush.bf16.msra.mxu2 %v1277_v25 }
  0xaf   :  { %306 = vmatmul.bf16.gmra.mxu0 %v1252_v24  ;;  %v347_v30 = vmax.f32 %v268_v27, 0.0  ;;  %v1276_v27 = vld [vmem:[#allocation5 + $0x80] sm:$0xff] }
  0xb2   :  { %679 = vmatpush.bf16.msra.mxu2 %v1276_v27 }
  0xb4   :  { %v269_v28 = vpop.f32.mrf.mxu0 }
  0xb5   :  { %v270_v29 = vadd.f32 %v1447_v26, %v269_v28 }
  0xb7   :  { %v348_v31 = vmax.f32 %v270_v29, 0.0 }
  0xb9   :  { %v398_v32 = vpack.c.bf16 %v348_v31, %v347_v30 }
  0xbb   :  { %473 = vmatmul.bf16.vlgmr.msra.gmra.mxu1 %v398_v32 }
  0xbc   :  { %v272_v34 = vpop.f32.mrf.mxu0 }
  0xbd   :  { %v273_v35 = vadd.f32 %v1447_v26, %v272_v34 }
  0xbf   :  { %311 = vmatmul.bf16.gmra.mxu0 %v1253_v33  ;;  %v349_v38 = vmax.f32 %v273_v35, 0.0 }
  0xc4   :  { %v274_v36 = vpop.f32.mrf.mxu0 }
  0xc5   :  { %v275_v37 = vadd.f32 %v1447_v26, %v274_v36 }
  0xc7   :  { %v350_v39 = vmax.f32 %v275_v37, 0.0 }
  0xc9   :  { %v399_v40 = vpack.c.bf16 %v350_v39, %v349_v38 }
  0xcb   :  { %478 = vmatmul.bf16.gmra.mxu1 %v399_v40 }
  0xcc   :  { %v277_v42 = vpop.f32.mrf.mxu0 }
  0xcd   :  { %v278_v43 = vadd.f32 %v1447_v26, %v277_v42  ;;  %v1467_v42 = vld [vmem:[#allocation7 + $0x1] ss:$0 sm:$0xff] }
  0xcf   :  { %316 = vmatmul.bf16.gmra.mxu0 %v1254_v41  ;;  %v351_v46 = vmax.f32 %v278_v43, 0.0 }
  0xd4   :  { %v279_v44 = vpop.f32.mrf.mxu0 }
  0xd5   :  { %v280_v45 = vadd.f32 %v1447_v26, %v279_v44 }
  0xd7   :  { %v352_v47 = vmax.f32 %v280_v45, 0.0 }
  0xd9   :  { %v400_v48 = vpack.c.bf16 %v352_v47, %v351_v46 }
  0xdb   :  { %483 = vmatmul.bf16.gmra.mxu1 %v400_v48 }
  0xdc   :  { %v282_v50 = vpop.f32.mrf.mxu0 }
  0xdd   :  { %v283_v51 = vadd.f32 %v1447_v26, %v282_v50 }
  0xdf   :  { %321 = vmatmul.bf16.gmra.mxu0 %v1255_v49  ;;  %v353_v54 = vmax.f32 %v283_v51, 0.0 }
  0xe4   :  { %v284_v52 = vpop.f32.mrf.mxu0 }
  0xe5   :  { %v285_v53 = vadd.f32 %v1447_v26, %v284_v52 }
  0xe7   :  { %v354_v55 = vmax.f32 %v285_v53, 0.0 }
  0xe9   :  { %v401_v56 = vpack.c.bf16 %v354_v55, %v353_v54 }
  0xeb   :  { %488 = vmatmul.bf16.gmra.mxu1 %v401_v56 }
  0xec   :  { %v287_v58 = vpop.f32.mrf.mxu0 }
  0xed   :  { %v288_v59 = vadd.f32 %v1447_v26, %v287_v58 }
  0xef   :  { %326 = vmatmul.bf16.gmra.mxu0 %v1256_v57  ;;  %v355_v62 = vmax.f32 %v288_v59, 0.0 }
  0xf4   :  { %v289_v60 = vpop.f32.mrf.mxu0 }
  0xf5   :  { %v290_v61 = vadd.f32 %v1447_v26, %v289_v60 }
  0xf7   :  { %v356_v63 = vmax.f32 %v290_v61, 0.0 }
  0xf9   :  { %v402_v0 = vpack.c.bf16 %v356_v63, %v355_v62 }
  0xfb   :  { %493 = vmatmul.bf16.gmra.mxu1 %v402_v0 }
  0xfc   :  { %v292_v2 = vpop.f32.mrf.mxu0 }
  0xfd   :  { %v293_v3 = vadd.f32 %v1447_v26, %v292_v2 }
  0xff   :  { %331 = vmatmul.bf16.gmra.mxu0 %v1257_v1  ;;  %v357_v7 = vmax.f32 %v293_v3, 0.0 }
 0x104   :  { %v294_v4 = vpop.f32.mrf.mxu0 }
 0x105   :  { %v295_v5 = vadd.f32 %v1447_v26, %v294_v4 }
 0x107   :  { %v358_v8 = vmax.f32 %v295_v5, 0.0 }
 0x109   :  { %v403_v9 = vpack.c.bf16 %v358_v8, %v357_v7 }
 0x10b   :  { %498 = vmatmul.bf16.gmra.mxu1 %v403_v9 }
 0x10c   :  { %v297_v12 = vpop.f32.mrf.mxu0 }
 0x10d   :  { %v298_v15 = vadd.f32 %v1447_v26, %v297_v12 }
 0x10f   :  { %336 = vmatmul.bf16.gmra.mxu0 %v1258_v11  ;;  %v359_v19 = vmax.f32 %v298_v15, 0.0 }
 0x114   :  { %v299_v16 = vpop.f32.mrf.mxu0 }
 0x115   :  { %v300_v17 = vadd.f32 %v1447_v26, %v299_v16 }
 0x117   :  { %v360_v20 = vmax.f32 %v300_v17, 0.0 }
 0x119   :  { %v404_v21 = vpack.c.bf16 %v360_v20, %v359_v19 }
 0x11b   :  { %503 = vmatmul.bf16.gmra.mxu1 %v404_v21 }
 0x11c   :  { %v302_v24 = vpop.f32.mrf.mxu0 }
 0x11d   :  { %v303_v28 = vadd.f32 %v1447_v26, %v302_v24 }
 0x11f   :  { %341 = vmatmul.bf16.gmra.mxu0 %v1259_v23  ;;  %v361_v31 = vmax.f32 %v303_v28, 0.0 }
 0x124   :  { %v304_v29 = vpop.f32.mrf.mxu0 }
 0x125   :  { %v305_v30 = vadd.f32 %v1447_v26, %v304_v29 }
 0x127   :  { %v362_v32 = vmax.f32 %v305_v30, 0.0 }
 0x129   :  { %v405_v33 = vpack.c.bf16 %v362_v32, %v361_v31 }
 0x12b   :  { %508 = vmatmul.bf16.gmra.mxu1 %v405_v33 }
 0x12c   :  { %v307_v34 = vpop.f32.mrf.mxu0 }
 0x12d   :  { %v308_v35 = vadd.f32 %v1447_v26, %v307_v34 }
 0x12f   :  { %v363_v38 = vmax.f32 %v308_v35, 0.0 }
 0x134   :  { %v309_v36 = vpop.f32.mrf.mxu0 }
 0x135   :  { %v310_v37 = vadd.f32 %v1447_v26, %v309_v36 }
 0x137   :  { %v364_v39 = vmax.f32 %v310_v37, 0.0 }
 0x138   :  { %v474_v40 = vpop.f32.mrf.mxu1 }
 0x139   :  { %v406_v41 = vpack.c.bf16 %v364_v39, %v363_v38  ;;  %v475_v44 = vadd.f32 %v1467_v42, %v474_v40 }
 0x13b   :  { %513 = vmatmul.bf16.gmra.mxu1 %v406_v41  ;;  %v554_v47 = vmax.f32 %v475_v44, 0.0 }
 0x13c   :  { %v312_v43 = vpop.f32.mrf.mxu0 }
 0x13d   :  { %v313_v48 = vadd.f32 %v1447_v26, %v312_v43 }
 0x13f   :  { %v365_v53 = vmax.f32 %v313_v48, 0.0 }
 0x140   :  { %v476_v45 = vpop.f32.mrf.mxu1 }
 0x141   :  { %v477_v46 = vadd.f32 %v1467_v42, %v476_v45 }
 0x143   :  { %v555_v49 = vmax.f32 %v477_v46, 0.0 }
 0x144   :  { %v314_v50 = vpop.f32.mrf.mxu0 }
 0x145   :  { %v315_v51 = vadd.f32 %v1447_v26, %v314_v50  ;;  %v605_v52 = vpack.c.bf16 %v555_v49, %v554_v47 }
 0x147   :  { %v366_v54 = vmax.f32 %v315_v51, 0.0  ;;  %680 = vmatmul.bf16.vlgmr.msra.gmra.mxu2 %v605_v52 }
 0x148   :  { %v479_v55 = vpop.f32.mrf.mxu1 }
 0x149   :  { %v407_v56 = vpack.c.bf16 %v366_v54, %v365_v53  ;;  %v480_v58 = vadd.f32 %v1467_v42, %v479_v55 }
 0x14b   :  { %518 = vmatmul.bf16.gmra.mxu1 %v407_v56  ;;  %v556_v61 = vmax.f32 %v480_v58, 0.0 }
 0x14c   :  { %v317_v57 = vpop.f32.mrf.mxu0 }
 0x14d   :  { %v318_v62 = vadd.f32 %v1447_v26, %v317_v57 }
 0x14f   :  { %v367_v3 = vmax.f32 %v318_v62, 0.0 }
 0x150   :  { %v481_v59 = vpop.f32.mrf.mxu1 }
 0x151   :  { %v482_v60 = vadd.f32 %v1467_v42, %v481_v59 }
 0x153   :  { %v557_v63 = vmax.f32 %v482_v60, 0.0 }
 0x154   :  { %v319_v0 = vpop.f32.mrf.mxu0 }
 0x155   :  { %v320_v1 = vadd.f32 %v1447_v26, %v319_v0  ;;  %v606_v2 = vpack.c.bf16 %v557_v63, %v556_v61  ;;  %v1291_v0 = vld [vmem:[#allocation5 + $0xf8] sm:$0xff] }
 0x156   :  { %879 = vmatpush.bf16.msra.mxu3 %v1291_v0 }
 0x157   :  { %v368_v4 = vmax.f32 %v320_v1, 0.0  ;;  %685 = vmatmul.bf16.gmra.mxu2 %v606_v2  ;;  %v1290_v2 = vld [vmem:[#allocation5 + $0xf0] sm:$0xff] }
 0x158   :  { %v484_v5 = vpop.f32.mrf.mxu1 }
 0x159   :  { %v408_v6 = vpack.c.bf16 %v368_v4, %v367_v3  ;;  %v485_v8 = vadd.f32 %v1467_v42, %v484_v5 }
 0x15a   :  { %880 = vmatpush.bf16.msra.mxu3 %v1290_v2 }
 0x15b   :  { %523 = vmatmul.bf16.gmra.mxu1 %v408_v6  ;;  %v558_v11 = vmax.f32 %v485_v8, 0.0  ;;  %v1289_v6 = vld [vmem:[#allocation5 + $0xe8] sm:$0xff] }
 0x15c   :  { %v322_v7 = vpop.f32.mrf.mxu0 }
 0x15d   :  { %v323_v12 = vadd.f32 %v1447_v26, %v322_v7 }
 0x15e   :  { %881 = vmatpush.bf16.msra.mxu3 %v1289_v6 }
 0x15f   :  { %v369_v17 = vmax.f32 %v323_v12, 0.0 }
 0x160   :  { %v486_v9 = vpop.f32.mrf.mxu1 }
 0x161   :  { %v487_v10 = vadd.f32 %v1467_v42, %v486_v9 }
 0x163   :  { %v559_v13 = vmax.f32 %v487_v10, 0.0 }
 0x164   :  { %v324_v14 = vpop.f32.mrf.mxu0 }
 0x165   :  { %v325_v15 = vadd.f32 %v1447_v26, %v324_v14  ;;  %v607_v16 = vpack.c.bf16 %v559_v13, %v558_v11  ;;  %v1288_v11 = vld [vmem:[#allocation5 + $0xe0] sm:$0xff] }
 0x166   :  { %882 = vmatpush.bf16.msra.mxu3 %v1288_v11 }
 0x167   :  { %v370_v18 = vmax.f32 %v325_v15, 0.0  ;;  %690 = vmatmul.bf16.gmra.mxu2 %v607_v16 }
 0x168   :  { %v489_v19 = vpop.f32.mrf.mxu1 }
 0x169   :  { %v409_v20 = vpack.c.bf16 %v370_v18, %v369_v17  ;;  %v490_v22 = vadd.f32 %v1467_v42, %v489_v19  ;;  %v1287_v18 = vld [vmem:[#allocation5 + $0xd8] sm:$0xff] }
 0x16a   :  { %883 = vmatpush.bf16.msra.mxu3 %v1287_v18 }
 0x16b   :  { %528 = vmatmul.bf16.gmra.mxu1 %v409_v20  ;;  %v560_v25 = vmax.f32 %v490_v22, 0.0  ;;  %v1286_v20 = vld [vmem:[#allocation5 + $0xd0] sm:$0xff] }
 0x16c   :  { %v327_v21 = vpop.f32.mrf.mxu0 }
 0x16d   :  { %v328_v27 = vadd.f32 %v1447_v26, %v327_v21 }
 0x16e   :  { %884 = vmatpush.bf16.msra.mxu3 %v1286_v20 }
 0x16f   :  { %v371_v32 = vmax.f32 %v328_v27, 0.0  ;;  %v1284_v27 = vld [vmem:[#allocation5 + $0xc0] sm:$0xff] }
 0x170   :  { %v491_v23 = vpop.f32.mrf.mxu1 }
 0x171   :  { %v492_v24 = vadd.f32 %v1467_v42, %v491_v23  ;;  %v1285_v23 = vld [vmem:[#allocation5 + $0xc8] sm:$0xff] }
 0x172   :  { %885 = vmatpush.bf16.msra.mxu3 %v1285_v23 }
 0x173   :  { %v561_v28 = vmax.f32 %v492_v24, 0.0 }
 0x174   :  { %v329_v29 = vpop.f32.mrf.mxu0 }
 0x175   :  { %v330_v30 = vadd.f32 %v1447_v26, %v329_v29  ;;  %v608_v31 = vpack.c.bf16 %v561_v28, %v560_v25 }
 0x176   :  { %886 = vmatpush.bf16.msra.mxu3 %v1284_v27 }
 0x177   :  { %v372_v33 = vmax.f32 %v330_v30, 0.0  ;;  %695 = vmatmul.bf16.gmra.mxu2 %v608_v31 }
 0x178   :  { %v494_v34 = vpop.f32.mrf.mxu1 }
 0x179   :  { %v410_v35 = vpack.c.bf16 %v372_v33, %v371_v32  ;;  %v495_v37 = vadd.f32 %v1467_v42, %v494_v34 }
 0x17b   :  { %533 = vmatmul.bf16.gmra.mxu1 %v410_v35  ;;  %v562_v40 = vmax.f32 %v495_v37, 0.0 }
 0x17c   :  { %v332_v36 = vpop.f32.mrf.mxu0 }
 0x17d   :  { %v333_v41 = vadd.f32 %v1447_v26, %v332_v36 }
 0x17f   :  { %v373_v47 = vmax.f32 %v333_v41, 0.0 }
 0x180   :  { %v496_v38 = vpop.f32.mrf.mxu1 }
 0x181   :  { %v497_v39 = vadd.f32 %v1467_v42, %v496_v38  ;;  %v1501_v38 = vld [vmem:[#allocation7 + $0x2] ss:$0 sm:$0xff] }
 0x183   :  { %v563_v43 = vmax.f32 %v497_v39, 0.0 }
 0x184   :  { %v334_v44 = vpop.f32.mrf.mxu0 }
 0x185   :  { %v335_v45 = vadd.f32 %v1447_v26, %v334_v44  ;;  %v609_v46 = vpack.c.bf16 %v563_v43, %v562_v40 }
 0x187   :  { %v374_v48 = vmax.f32 %v335_v45, 0.0  ;;  %700 = vmatmul.bf16.gmra.mxu2 %v609_v46 }
 0x188   :  { %v499_v49 = vpop.f32.mrf.mxu1 }
 0x189   :  { %v411_v50 = vpack.c.bf16 %v374_v48, %v373_v47  ;;  %v500_v52 = vadd.f32 %v1467_v42, %v499_v49 }
 0x18b   :  { %538 = vmatmul.bf16.gmra.mxu1 %v411_v50  ;;  %v564_v55 = vmax.f32 %v500_v52, 0.0 }
 0x18c   :  { %v337_v51 = vpop.f32.mrf.mxu0 }
 0x18d   :  { %v338_v56 = vadd.f32 %v1447_v26, %v337_v51 }
 0x18f   :  { %v375_v61 = vmax.f32 %v338_v56, 0.0 }
 0x190   :  { %v501_v53 = vpop.f32.mrf.mxu1 }
 0x191   :  { %v502_v54 = vadd.f32 %v1467_v42, %v501_v53 }
 0x193   :  { %v565_v57 = vmax.f32 %v502_v54, 0.0 }
 0x194   :  { %v339_v58 = vpop.f32.mrf.mxu0 }
 0x195   :  { %v340_v59 = vadd.f32 %v1447_v26, %v339_v58  ;;  %v610_v60 = vpack.c.bf16 %v565_v57, %v564_v55 }
 0x197   :  { %v376_v62 = vmax.f32 %v340_v59, 0.0  ;;  %705 = vmatmul.bf16.gmra.mxu2 %v610_v60 }
 0x198   :  { %v504_v63 = vpop.f32.mrf.mxu1 }
 0x199   :  { %v412_v1 = vpack.c.bf16 %v376_v62, %v375_v61  ;;  %v505_v4 = vadd.f32 %v1467_v42, %v504_v63 }
 0x19b   :  { %543 = vmatmul.bf16.gmra.mxu1 %v412_v1  ;;  %v566_v8 = vmax.f32 %v505_v4, 0.0 }
 0x19c   :  { %v342_v3 = vpop.f32.mrf.mxu0 }
 0x19d   :  { %v343_v9 = vadd.f32 %v1447_v26, %v342_v3 }
 0x19f   :  { %v377_v15 = vmax.f32 %v343_v9, 0.0 }
 0x1a0   :  { %v506_v5 = vpop.f32.mrf.mxu1 }
 0x1a1   :  { %v507_v7 = vadd.f32 %v1467_v42, %v506_v5 }
 0x1a3   :  { %v567_v10 = vmax.f32 %v507_v7, 0.0 }
 0x1a4   :  { %v344_v12 = vpop.f32.mrf.mxu0 }
 0x1a5   :  { %v345_v13 = vadd.f32 %v1447_v26, %v344_v12  ;;  %v611_v14 = vpack.c.bf16 %v567_v10, %v566_v8 }
 0x1a7   :  { %v378_v16 = vmax.f32 %v345_v13, 0.0  ;;  %710 = vmatmul.bf16.gmra.mxu2 %v611_v14 }
 0x1a8   :  { %v509_v17 = vpop.f32.mrf.mxu1 }
 0x1a9   :  { %v413_v19 = vpack.c.bf16 %v378_v16, %v377_v15  ;;  %v510_v21 = vadd.f32 %v1467_v42, %v509_v17 }
 0x1ab   :  { %548 = vmatmul.bf16.gmra.mxu1 %v413_v19  ;;  %v568_v26 = vmax.f32 %v510_v21, 0.0 }
 0x1b0   :  { %v511_v22 = vpop.f32.mrf.mxu1 }
 0x1b1   :  { %v512_v24 = vadd.f32 %v1467_v42, %v511_v22 }
 0x1b3   :  { %v569_v25 = vmax.f32 %v512_v24, 0.0 }
 0x1b5   :  { %v612_v28 = vpack.c.bf16 %v569_v25, %v568_v26 }
 0x1b7   :  { %715 = vmatmul.bf16.gmra.mxu2 %v612_v28 }
 0x1b8   :  { %v514_v29 = vpop.f32.mrf.mxu1 }
 0x1b9   :  { %v515_v30 = vadd.f32 %v1467_v42, %v514_v29 }
 0x1bb   :  { %v570_v33 = vmax.f32 %v515_v30, 0.0 }
 0x1c0   :  { %v516_v31 = vpop.f32.mrf.mxu1 }
 0x1c1   :  { %v517_v32 = vadd.f32 %v1467_v42, %v516_v31 }
 0x1c3   :  { %v571_v34 = vmax.f32 %v517_v32, 0.0 }
 0x1c5   :  { %v613_v35 = vpack.c.bf16 %v571_v34, %v570_v33 }
 0x1c7   :  { %720 = vmatmul.bf16.gmra.mxu2 %v613_v35 }
 0x1c8   :  { %v519_v36 = vpop.f32.mrf.mxu1 }
 0x1c9   :  { %v520_v39 = vadd.f32 %v1467_v42, %v519_v36 }
 0x1ca   :  { %v681_v37 = vpop.f32.mrf.mxu2 }
 0x1cb   :  { %v682_v41 = vadd.f32 %v1501_v38, %v681_v37  ;;  %v572_v45 = vmax.f32 %v520_v39, 0.0 }
 0x1cd   :  { %v761_v48 = vmax.f32 %v682_v41, 0.0 }
 0x1d0   :  { %v521_v40 = vpop.f32.mrf.mxu1 }
 0x1d1   :  { %v522_v43 = vadd.f32 %v1467_v42, %v521_v40 }
 0x1d2   :  { %v683_v44 = vpop.f32.mrf.mxu2 }
 0x1d3   :  { %v573_v46 = vmax.f32 %v522_v43, 0.0  ;;  %v684_v47 = vadd.f32 %v1501_v38, %v683_v44 }
 0x1d5   :  { %v762_v49 = vmax.f32 %v684_v47, 0.0  ;;  %v614_v50 = vpack.c.bf16 %v573_v46, %v572_v45 }
 0x1d7   :  { %725 = vmatmul.bf16.gmra.mxu2 %v614_v50  ;;  %v812_v51 = vpack.c.bf16 %v762_v49, %v761_v48 }
 0x1d8   :  { %v524_v52 = vpop.f32.mrf.mxu1 }
 0x1d9   :  { %887 = vmatmul.bf16.vlgmr.msra.gmra.mxu3 %v812_v51  ;;  %v525_v54 = vadd.f32 %v1467_v42, %v524_v52 }
 0x1da   :  { %v686_v53 = vpop.f32.mrf.mxu2 }
 0x1db   :  { %v687_v56 = vadd.f32 %v1501_v38, %v686_v53  ;;  %v574_v59 = vmax.f32 %v525_v54, 0.0 }
 0x1dd   :  { %v763_v62 = vmax.f32 %v687_v56, 0.0 }
 0x1e0   :  { %v526_v55 = vpop.f32.mrf.mxu1 }
 0x1e1   :  { %v527_v57 = vadd.f32 %v1467_v42, %v526_v55 }
 0x1e2   :  { %v688_v58 = vpop.f32.mrf.mxu2 }
 0x1e3   :  { %v575_v60 = vmax.f32 %v527_v57, 0.0  ;;  %v689_v61 = vadd.f32 %v1501_v38, %v688_v58 }
 0x1e5   :  { %v764_v63 = vmax.f32 %v689_v61, 0.0  ;;  %v615_v0 = vpack.c.bf16 %v575_v60, %v574_v59 }
 0x1e7   :  { %730 = vmatmul.bf16.gmra.mxu2 %v615_v0  ;;  %v813_v1 = vpack.c.bf16 %v764_v63, %v763_v62 }
 0x1e8   :  { %v529_v2 = vpop.f32.mrf.mxu1 }
 0x1e9   :  { %892 = vmatmul.bf16.gmra.mxu3 %v813_v1  ;;  %v530_v4 = vadd.f32 %v1467_v42, %v529_v2 }
 0x1ea   :  { %v691_v3 = vpop.f32.mrf.mxu2 }
 0x1eb   :  { %v692_v6 = vadd.f32 %v1501_v38, %v691_v3  ;;  %v576_v9 = vmax.f32 %v530_v4, 0.0 }
 0x1ed   :  { %v765_v12 = vmax.f32 %v692_v6, 0.0 }
 0x1f0   :  { %v531_v5 = vpop.f32.mrf.mxu1 }
 0x1f1   :  { %v532_v7 = vadd.f32 %v1467_v42, %v531_v5 }
 0x1f2   :  { %v693_v8 = vpop.f32.mrf.mxu2 }
 0x1f3   :  { %v577_v10 = vmax.f32 %v532_v7, 0.0  ;;  %v694_v11 = vadd.f32 %v1501_v38, %v693_v8 }
 0x1f5   :  { %v766_v13 = vmax.f32 %v694_v11, 0.0  ;;  %v616_v14 = vpack.c.bf16 %v577_v10, %v576_v9 }
 0x1f7   :  { %735 = vmatmul.bf16.gmra.mxu2 %v616_v14  ;;  %v814_v15 = vpack.c.bf16 %v766_v13, %v765_v12 }
 0x1f8   :  { %v534_v16 = vpop.f32.mrf.mxu1 }
 0x1f9   :  { %897 = vmatmul.bf16.gmra.mxu3 %v814_v15  ;;  %v535_v18 = vadd.f32 %v1467_v42, %v534_v16 }
 0x1fa   :  { %v696_v17 = vpop.f32.mrf.mxu2 }
 0x1fb   :  { %v697_v20 = vadd.f32 %v1501_v38, %v696_v17  ;;  %v578_v23 = vmax.f32 %v535_v18, 0.0 }
 0x1fd   :  { %v767_v25 = vmax.f32 %v697_v20, 0.0 }
 0x200   :  { %v536_v19 = vpop.f32.mrf.mxu1 }
 0x201   :  { %v537_v21 = vadd.f32 %v1467_v42, %v536_v19 }
 0x202   :  { %v698_v22 = vpop.f32.mrf.mxu2 }
 0x203   :  { %v579_v24 = vmax.f32 %v537_v21, 0.0  ;;  %v699_v26 = vadd.f32 %v1501_v38, %v698_v22 }
 0x205   :  { %v617_v27 = vpack.c.bf16 %v579_v24, %v578_v23  ;;  %v768_v28 = vmax.f32 %v699_v26, 0.0  ;;  %v1535_v23 = vld [vmem:[#allocation7 + $0x3] ss:$0 sm:$0xff] }
 0x207   :  { %740 = vmatmul.bf16.gmra.mxu2 %v617_v27  ;;  %v815_v29 = vpack.c.bf16 %v768_v28, %v767_v25 }
 0x208   :  { %v539_v30 = vpop.f32.mrf.mxu1 }
 0x209   :  { %902 = vmatmul.bf16.gmra.mxu3 %v815_v29  ;;  %v540_v32 = vadd.f32 %v1467_v42, %v539_v30 }
 0x20a   :  { %v701_v31 = vpop.f32.mrf.mxu2 }
 0x20b   :  { %v702_v34 = vadd.f32 %v1501_v38, %v701_v31  ;;  %v580_v37 = vmax.f32 %v540_v32, 0.0 }
 0x20d   :  { %v769_v41 = vmax.f32 %v702_v34, 0.0 }
 0x210   :  { %v541_v33 = vpop.f32.mrf.mxu1 }
 0x211   :  { %v542_v35 = vadd.f32 %v1467_v42, %v541_v33 }
 0x212   :  { %v703_v36 = vpop.f32.mrf.mxu2 }
 0x213   :  { %v581_v39 = vmax.f32 %v542_v35, 0.0  ;;  %v704_v40 = vadd.f32 %v1501_v38, %v703_v36 }
 0x215   :  { %v618_v43 = vpack.c.bf16 %v581_v39, %v580_v37  ;;  %v770_v44 = vmax.f32 %v704_v40, 0.0 }
 0x217   :  { %745 = vmatmul.bf16.gmra.mxu2 %v618_v43  ;;  %v816_v45 = vpack.c.bf16 %v770_v44, %v769_v41 }
 0x218   :  { %v544_v46 = vpop.f32.mrf.mxu1 }
 0x219   :  { %907 = vmatmul.bf16.gmra.mxu3 %v816_v45  ;;  %v545_v48 = vadd.f32 %v1467_v42, %v544_v46 }
 0x21a   :  { %v706_v47 = vpop.f32.mrf.mxu2 }
 0x21b   :  { %v707_v50 = vadd.f32 %v1501_v38, %v706_v47  ;;  %v582_v53 = vmax.f32 %v545_v48, 0.0 }
 0x21d   :  { %v771_v56 = vmax.f32 %v707_v50, 0.0 }
 0x220   :  { %v546_v49 = vpop.f32.mrf.mxu1 }
 0x221   :  { %v547_v51 = vadd.f32 %v1467_v42, %v546_v49 }
 0x222   :  { %v708_v52 = vpop.f32.mrf.mxu2 }
 0x223   :  { %v583_v54 = vmax.f32 %v547_v51, 0.0  ;;  %v709_v55 = vadd.f32 %v1501_v38, %v708_v52 }
 0x225   :  { %v619_v57 = vpack.c.bf16 %v583_v54, %v582_v53  ;;  %v772_v58 = vmax.f32 %v709_v55, 0.0 }
 0x227   :  { %750 = vmatmul.bf16.gmra.mxu2 %v619_v57  ;;  %v817_v59 = vpack.c.bf16 %v772_v58, %v771_v56 }
 0x228   :  { %v549_v60 = vpop.f32.mrf.mxu1 }
 0x229   :  { %912 = vmatmul.bf16.gmra.mxu3 %v817_v59  ;;  %v550_v62 = vadd.f32 %v1467_v42, %v549_v60 }
 0x22a   :  { %v711_v61 = vpop.f32.mrf.mxu2 }
 0x22b   :  { %v712_v0 = vadd.f32 %v1501_v38, %v711_v61  ;;  %v584_v3 = vmax.f32 %v550_v62, 0.0 }
 0x22d   :  { %v773_v6 = vmax.f32 %v712_v0, 0.0 }
 0x230   :  { %v551_v63 = vpop.f32.mrf.mxu1 }
 0x231   :  { %v552_v1 = vadd.f32 %v1467_v42, %v551_v63 }
 0x232   :  { %v713_v2 = vpop.f32.mrf.mxu2 }
 0x233   :  { %v585_v4 = vmax.f32 %v552_v1, 0.0  ;;  %v714_v5 = vadd.f32 %v1501_v38, %v713_v2 }
 0x235   :  { %v620_v7 = vpack.c.bf16 %v585_v4, %v584_v3  ;;  %v774_v8 = vmax.f32 %v714_v5, 0.0 }
 0x237   :  { %755 = vmatmul.bf16.gmra.mxu2 %v620_v7  ;;  %v818_v9 = vpack.c.bf16 %v774_v8, %v773_v6 }
 0x239   :  { %917 = vmatmul.bf16.gmra.mxu3 %v818_v9 }
 0x23a   :  { %v716_v10 = vpop.f32.mrf.mxu2 }
 0x23b   :  { %v717_v11 = vadd.f32 %v1501_v38, %v716_v10 }
 0x23d   :  { %v775_v14 = vmax.f32 %v717_v11, 0.0 }
 0x242   :  { %v718_v12 = vpop.f32.mrf.mxu2 }
 0x243   :  { %v719_v13 = vadd.f32 %v1501_v38, %v718_v12 }
 0x245   :  { %v776_v15 = vmax.f32 %v719_v13, 0.0 }
 0x247   :  { %v819_v42 = vpack.c.bf16 %v776_v15, %v775_v14 }
 0x249   :  { %922 = vmatmul.bf16.gmra.mxu3 %v819_v42 }
 0x24a   :  { %v721_v16 = vpop.f32.mrf.mxu2 }
 0x24b   :  { %v722_v17 = vadd.f32 %v1501_v38, %v721_v16 }
 0x24d   :  { %v777_v20 = vmax.f32 %v722_v17, 0.0 }
 0x252   :  { %v723_v18 = vpop.f32.mrf.mxu2 }
 0x253   :  { %v724_v19 = vadd.f32 %v1501_v38, %v723_v18 }
 0x255   :  { %v778_v21 = vmax.f32 %v724_v19, 0.0 }
 0x257   :  { %v820_v22 = vpack.c.bf16 %v778_v21, %v777_v20 }
 0x259   :  { %927 = vmatmul.bf16.gmra.mxu3 %v820_v22 }
 0x25a   :  { %v726_v24 = vpop.f32.mrf.mxu2 }
 0x25b   :  { %v727_v28 = vadd.f32 %v1501_v38, %v726_v24 }
 0x25c   :  { %v888_v26 = vpop.f32.mrf.mxu3 }
 0x25d   :  { %v889_v25 = vadd.f32 %v1535_v23, %v888_v26  ;;  %v779_v32 = vmax.f32 %v727_v28, 0.0 }
 0x25f   :  { %v968_v27 = vmax.f32 %v889_v25, 0.0 }
 0x261   :  { %1000 = vst [vmem:[#allocation8] sm:$0xff] %v968_v27 }
 0x262   :  { %v728_v29 = vpop.f32.mrf.mxu2 }
 0x263   :  { %v729_v30 = vadd.f32 %v1501_v38, %v728_v29 }
 0x264   :  { %v890_v31 = vpop.f32.mrf.mxu3 }
 0x265   :  { %v780_v33 = vmax.f32 %v729_v30, 0.0  ;;  %v891_v34 = vadd.f32 %v1535_v23, %v890_v31 }
 0x267   :  { %v969_v35 = vmax.f32 %v891_v34, 0.0  ;;  %v821_v36 = vpack.c.bf16 %v780_v33, %v779_v32 }
 0x269   :  { %1001 = vst [vmem:[#allocation8 + $0x8] sm:$0xff] %v969_v35  ;;  %932 = vmatmul.bf16.gmra.mxu3 %v821_v36 }
 0x26a   :  { %v731_v37 = vpop.f32.mrf.mxu2 }
 0x26b   :  { %v732_v43 = vadd.f32 %v1501_v38, %v731_v37 }
 0x26c   :  { %v893_v39 = vpop.f32.mrf.mxu3 }
 0x26d   :  { %v894_v40 = vadd.f32 %v1535_v23, %v893_v39  ;;  %v781_v47 = vmax.f32 %v732_v43, 0.0 }
 0x26f   :  { %v970_v41 = vmax.f32 %v894_v40, 0.0 }
 0x271   :  { %1002 = vst [vmem:[#allocation8 + $0x10] sm:$0xff] %v970_v41 }
 0x272   :  { %v733_v44 = vpop.f32.mrf.mxu2 }
 0x273   :  { %v734_v45 = vadd.f32 %v1501_v38, %v733_v44 }
 0x274   :  { %v895_v46 = vpop.f32.mrf.mxu3 }
 0x275   :  { %v782_v48 = vmax.f32 %v734_v45, 0.0  ;;  %v896_v49 = vadd.f32 %v1535_v23, %v895_v46 }
 0x277   :  { %v971_v50 = vmax.f32 %v896_v49, 0.0  ;;  %v822_v51 = vpack.c.bf16 %v782_v48, %v781_v47 }
 0x279   :  { %1003 = vst [vmem:[#allocation8 + $0x18] sm:$0xff] %v971_v50  ;;  %937 = vmatmul.bf16.gmra.mxu3 %v822_v51 }
 0x27a   :  { %v736_v52 = vpop.f32.mrf.mxu2 }
 0x27b   :  { %v737_v56 = vadd.f32 %v1501_v38, %v736_v52 }
 0x27c   :  { %v898_v53 = vpop.f32.mrf.mxu3 }
 0x27d   :  { %v899_v54 = vadd.f32 %v1535_v23, %v898_v53  ;;  %v783_v60 = vmax.f32 %v737_v56, 0.0 }
 0x27f   :  { %v972_v55 = vmax.f32 %v899_v54, 0.0 }
 0x281   :  { %1004 = vst [vmem:[#allocation8 + $0x20] sm:$0xff] %v972_v55 }
 0x282   :  { %v738_v57 = vpop.f32.mrf.mxu2 }
 0x283   :  { %v739_v58 = vadd.f32 %v1501_v38, %v738_v57 }
 0x284   :  { %v900_v59 = vpop.f32.mrf.mxu3 }
 0x285   :  { %v784_v61 = vmax.f32 %v739_v58, 0.0  ;;  %v901_v62 = vadd.f32 %v1535_v23, %v900_v59 }
 0x287   :  { %v973_v63 = vmax.f32 %v901_v62, 0.0  ;;  %v823_v0 = vpack.c.bf16 %v784_v61, %v783_v60 }
 0x289   :  { %1005 = vst [vmem:[#allocation8 + $0x28] sm:$0xff] %v973_v63  ;;  %942 = vmatmul.bf16.gmra.mxu3 %v823_v0 }
 0x28a   :  { %v741_v1 = vpop.f32.mrf.mxu2 }
 0x28b   :  { %v742_v5 = vadd.f32 %v1501_v38, %v741_v1 }
 0x28c   :  { %v903_v2 = vpop.f32.mrf.mxu3 }
 0x28d   :  { %v904_v3 = vadd.f32 %v1535_v23, %v903_v2  ;;  %v785_v9 = vmax.f32 %v742_v5, 0.0 }
 0x28f   :  { %v974_v4 = vmax.f32 %v904_v3, 0.0 }
 0x291   :  { %1006 = vst [vmem:[#allocation8 + $0x30] sm:$0xff] %v974_v4 }
 0x292   :  { %v743_v6 = vpop.f32.mrf.mxu2 }
 0x293   :  { %v744_v7 = vadd.f32 %v1501_v38, %v743_v6 }
 0x294   :  { %v905_v8 = vpop.f32.mrf.mxu3 }
 0x295   :  { %v786_v10 = vmax.f32 %v744_v7, 0.0  ;;  %v906_v11 = vadd.f32 %v1535_v23, %v905_v8 }
 0x297   :  { %v824_v12 = vpack.c.bf16 %v786_v10, %v785_v9  ;;  %v975_v13 = vmax.f32 %v906_v11, 0.0 }
 0x299   :  { %1007 = vst [vmem:[#allocation8 + $0x38] sm:$0xff] %v975_v13  ;;  %947 = vmatmul.bf16.gmra.mxu3 %v824_v12 }
 0x29a   :  { %v746_v14 = vpop.f32.mrf.mxu2 }
 0x29b   :  { %v747_v17 = vadd.f32 %v1501_v38, %v746_v14 }
 0x29c   :  { %v908_v15 = vpop.f32.mrf.mxu3 }
 0x29d   :  { %v909_v42 = vadd.f32 %v1535_v23, %v908_v15  ;;  %v787_v21 = vmax.f32 %v747_v17, 0.0 }
 0x29f   :  { %v976_v16 = vmax.f32 %v909_v42, 0.0 }
 0x2a1   :  { %1008 = vst [vmem:[#allocation8 + $0x40] sm:$0xff] %v976_v16 }
 0x2a2   :  { %v748_v18 = vpop.f32.mrf.mxu2 }
 0x2a3   :  { %v749_v19 = vadd.f32 %v1501_v38, %v748_v18 }
 0x2a4   :  { %v910_v20 = vpop.f32.mrf.mxu3 }
 0x2a5   :  { %v788_v22 = vmax.f32 %v749_v19, 0.0  ;;  %v911_v24 = vadd.f32 %v1535_v23, %v910_v20 }
 0x2a7   :  { %v825_v26 = vpack.c.bf16 %v788_v22, %v787_v21  ;;  %v977_v25 = vmax.f32 %v911_v24, 0.0 }
 0x2a9   :  { %1009 = vst [vmem:[#allocation8 + $0x48] sm:$0xff] %v977_v25  ;;  %952 = vmatmul.bf16.gmra.mxu3 %v825_v26 }
 0x2aa   :  { %v751_v27 = vpop.f32.mrf.mxu2 }
 0x2ab   :  { %v752_v31 = vadd.f32 %v1501_v38, %v751_v27 }
 0x2ac   :  { %v913_v28 = vpop.f32.mrf.mxu3 }
 0x2ad   :  { %v914_v29 = vadd.f32 %v1535_v23, %v913_v28  ;;  %v789_v35 = vmax.f32 %v752_v31, 0.0 }
 0x2af   :  { %v978_v30 = vmax.f32 %v914_v29, 0.0 }
 0x2b1   :  { %1010 = vst [vmem:[#allocation8 + $0x50] sm:$0xff] %v978_v30 }
 0x2b2   :  { %v753_v32 = vpop.f32.mrf.mxu2 }
 0x2b3   :  { %v754_v33 = vadd.f32 %v1501_v38, %v753_v32 }
 0x2b4   :  { %v915_v34 = vpop.f32.mrf.mxu3 }
 0x2b5   :  { %v790_v36 = vmax.f32 %v754_v33, 0.0  ;;  %v916_v37 = vadd.f32 %v1535_v23, %v915_v34 }
 0x2b7   :  { %v826_v39 = vpack.c.bf16 %v790_v36, %v789_v35  ;;  %v979_v40 = vmax.f32 %v916_v37, 0.0 }
 0x2b9   :  { %1011 = vst [vmem:[#allocation8 + $0x58] sm:$0xff] %v979_v40  ;;  %957 = vmatmul.bf16.gmra.mxu3 %v826_v39 }
 0x2ba   :  { %v756_v41 = vpop.f32.mrf.mxu2 }
 0x2bb   :  { %v757_v46 = vadd.f32 %v1501_v38, %v756_v41 }
 0x2bc   :  { %v918_v43 = vpop.f32.mrf.mxu3 }
 0x2bd   :  { %v919_v44 = vadd.f32 %v1535_v23, %v918_v43  ;;  %v791_v50 = vmax.f32 %v757_v46, 0.0 }
 0x2bf   :  { %v980_v45 = vmax.f32 %v919_v44, 0.0 }
 0x2c1   :  { %1012 = vst [vmem:[#allocation8 + $0x60] sm:$0xff] %v980_v45 }
 0x2c2   :  { %v758_v47 = vpop.f32.mrf.mxu2 }
 0x2c3   :  { %v759_v48 = vadd.f32 %v1501_v38, %v758_v47 }
 0x2c4   :  { %v920_v49 = vpop.f32.mrf.mxu3 }
 0x2c5   :  { %v792_v51 = vmax.f32 %v759_v48, 0.0  ;;  %v921_v52 = vadd.f32 %v1535_v23, %v920_v49 }
 0x2c7   :  { %v827_v53 = vpack.c.bf16 %v792_v51, %v791_v50  ;;  %v981_v54 = vmax.f32 %v921_v52, 0.0 }
 0x2c9   :  { %1013 = vst [vmem:[#allocation8 + $0x68] sm:$0xff] %v981_v54  ;;  %962 = vmatmul.bf16.gmra.mxu3 %v827_v53 }
 0x2cc   :  { %v923_v55 = vpop.f32.mrf.mxu3 }
 0x2cd   :  { %v924_v56 = vadd.f32 %v1535_v23, %v923_v55 }
 0x2cf   :  { %v982_v57 = vmax.f32 %v924_v56, 0.0 }
 0x2d1   :  { %1014 = vst [vmem:[#allocation8 + $0x70] sm:$0xff] %v982_v57 }
 0x2d4   :  { %v925_v58 = vpop.f32.mrf.mxu3 }
 0x2d5   :  { %v926_v59 = vadd.f32 %v1535_v23, %v925_v58 }
 0x2d7   :  { %v983_v60 = vmax.f32 %v926_v59, 0.0 }
 0x2d9   :  { %1015 = vst [vmem:[#allocation8 + $0x78] sm:$0xff] %v983_v60 }
 0x2dc   :  { %v928_v38 = vpop.f32.mrf.mxu3 }
 0x2dd   :  { %v929_v61 = vadd.f32 %v1535_v23, %v928_v38 }
 0x2df   :  { %v984_v62 = vmax.f32 %v929_v61, 0.0 }
 0x2e1   :  { %1016 = vst [vmem:[#allocation8 + $0x80] sm:$0xff] %v984_v62 }
 0x2e4   :  { %v930_v63 = vpop.f32.mrf.mxu3 }
 0x2e5   :  { %v931_v0 = vadd.f32 %v1535_v23, %v930_v63 }
 0x2e7   :  { %v985_v1 = vmax.f32 %v931_v0, 0.0 }
 0x2e9   :  { %1017 = vst [vmem:[#allocation8 + $0x88] sm:$0xff] %v985_v1 }
 0x2ec   :  { %v933_v2 = vpop.f32.mrf.mxu3 }
 0x2ed   :  { %v934_v3 = vadd.f32 %v1535_v23, %v933_v2 }
 0x2ef   :  { %v986_v4 = vmax.f32 %v934_v3, 0.0 }
 0x2f1   :  { %1018 = vst [vmem:[#allocation8 + $0x90] sm:$0xff] %v986_v4 }
 0x2f4   :  { %v935_v5 = vpop.f32.mrf.mxu3 }
 0x2f5   :  { %v936_v6 = vadd.f32 %v1535_v23, %v935_v5 }
 0x2f7   :  { %v987_v7 = vmax.f32 %v936_v6, 0.0 }
 0x2f9   :  { %1019 = vst [vmem:[#allocation8 + $0x98] sm:$0xff] %v987_v7 }
 0x2fc   :  { %v938_v8 = vpop.f32.mrf.mxu3 }
 0x2fd   :  { %v939_v9 = vadd.f32 %v1535_v23, %v938_v8 }
 0x2ff   :  { %v988_v10 = vmax.f32 %v939_v9, 0.0 }
 0x301   :  { %1020 = vst [vmem:[#allocation8 + $0xa0] sm:$0xff] %v988_v10 }
 0x304   :  { %v940_v11 = vpop.f32.mrf.mxu3 }
 0x305   :  { %v941_v12 = vadd.f32 %v1535_v23, %v940_v11 }
 0x307   :  { %v989_v13 = vmax.f32 %v941_v12, 0.0 }
 0x309   :  { %1021 = vst [vmem:[#allocation8 + $0xa8] sm:$0xff] %v989_v13 }
 0x30c   :  { %v943_v14 = vpop.f32.mrf.mxu3 }
 0x30d   :  { %v944_v15 = vadd.f32 %v1535_v23, %v943_v14 }
 0x30f   :  { %v990_v42 = vmax.f32 %v944_v15, 0.0 }
 0x311   :  { %1022 = vst [vmem:[#allocation8 + $0xb0] sm:$0xff] %v990_v42 }
 0x314   :  { %v945_v16 = vpop.f32.mrf.mxu3 }
 0x315   :  { %v946_v17 = vadd.f32 %v1535_v23, %v945_v16 }
 0x317   :  { %v991_v18 = vmax.f32 %v946_v17, 0.0 }
 0x319   :  { %1023 = vst [vmem:[#allocation8 + $0xb8] sm:$0xff] %v991_v18 }
 0x31c   :  { %v948_v19 = vpop.f32.mrf.mxu3 }
 0x31d   :  { %v949_v20 = vadd.f32 %v1535_v23, %v948_v19 }
 0x31f   :  { %v992_v21 = vmax.f32 %v949_v20, 0.0 }
 0x321   :  { %1024 = vst [vmem:[#allocation8 + $0xc0] sm:$0xff] %v992_v21 }
 0x324   :  { %v950_v22 = vpop.f32.mrf.mxu3 }
 0x325   :  { %v951_v24 = vadd.f32 %v1535_v23, %v950_v22 }
 0x327   :  { %v993_v26 = vmax.f32 %v951_v24, 0.0 }
 0x329   :  { %1025 = vst [vmem:[#allocation8 + $0xc8] sm:$0xff] %v993_v26 }
 0x32c   :  { %v953_v25 = vpop.f32.mrf.mxu3 }
 0x32d   :  { %v954_v27 = vadd.f32 %v1535_v23, %v953_v25 }
 0x32f   :  { %v994_v28 = vmax.f32 %v954_v27, 0.0 }
 0x331   :  { %1026 = vst [vmem:[#allocation8 + $0xd0] sm:$0xff] %v994_v28 }
 0x334   :  { %v955_v29 = vpop.f32.mrf.mxu3 }
 0x335   :  { %v956_v30 = vadd.f32 %v1535_v23, %v955_v29 }
 0x337   :  { %v995_v31 = vmax.f32 %v956_v30, 0.0 }
 0x339   :  { %1027 = vst [vmem:[#allocation8 + $0xd8] sm:$0xff] %v995_v31 }
 0x33c   :  { %v958_v32 = vpop.f32.mrf.mxu3 }
 0x33d   :  { %v959_v33 = vadd.f32 %v1535_v23, %v958_v32 }
 0x33f   :  { %v996_v34 = vmax.f32 %v959_v33, 0.0 }
 0x341   :  { %1028 = vst [vmem:[#allocation8 + $0xe0] sm:$0xff] %v996_v34 }
 0x344   :  { %v960_v35 = vpop.f32.mrf.mxu3 }
 0x345   :  { %v961_v36 = vadd.f32 %v1535_v23, %v960_v35 }
 0x347   :  { %v997_v37 = vmax.f32 %v961_v36, 0.0 }
 0x349   :  { %1029 = vst [vmem:[#allocation8 + $0xe8] sm:$0xff] %v997_v37 }
 0x34c   :  { %v963_v39 = vpop.f32.mrf.mxu3 }
 0x34d   :  { %v964_v40 = vadd.f32 %v1535_v23, %v963_v39 }
 0x34f   :  { %v998_v41 = vmax.f32 %v964_v40, 0.0 }
 0x351   :  { %1030 = vst [vmem:[#allocation8 + $0xf0] sm:$0xff] %v998_v41 }
 0x354   :  { %v965_v43 = vpop.f32.mrf.mxu3 }
 0x355   :  { %v966_v44 = vadd.f32 %v1535_v23, %v965_v43 }
 0x357   :  { %v999_v45 = vmax.f32 %v966_v44, 0.0 }
 0x359   :  { %1031 = vst [vmem:[#allocation8 + $0xf8] sm:$0xff] %v999_v45 }
 0x35a   :  { %1044 = dma.vmem_to_hbm [thread:$0]  %s1037_s2, 4096, %s1039_s5, [#allocation4], %s1416_s6, %s1416_s6, %s1417_s7  }
 0x35b   :  { %1406 = dma.done.wait [#allocation4], 4096  }
 0x35c   :  { %1407 = vsyncadd [#allocation4], 4294963200 }
 0x35d   :  { %1049 = vsyncpa [#allocation3], 1 }
 0x35e   :  { %1050 = vsyncpa [#allocation6], 1 }
 0x35f   :  { %1051 = vsyncpa [#allocation4], 1 }

</bundles_post_ra>
